<compile_context>
chip_gen: v7x
topology: tpu7x:2x2x1
jax: 0.10.0
libtpu: 0.0.40
codegen_flags: <defaults>
</compile_context>

<pallas_src>
import functools
import math

import jax
import jax.numpy as jnp
from jax.experimental import pallas as pl
from jax.experimental.pallas import tpu as pltpu


_SQRT_2_OVER_PI = 0.7978845608028654


def _round_up(x, m):
    return ((x + m - 1) // m) * m


def _gelu(x):
    # tanh-approx GELU (== torch.nn.GELU(approximate='tanh')); the tanh executes
    # in the EUP slot so the VALU is not the binding unit for the activation.
    return 0.5 * x * (1.0 + jnp.tanh(_SQRT_2_OVER_PI * (x + 0.044715 * (x * x * x))))


# ------------------------------ Pallas kernel ------------------------------

def _mlp_kernel(x_ref, win_ref, bin_ref,
                w1_ref, b1_ref, w2_ref, b2_ref,
                wout_ref, bout_ref, o_ref,
                *, block1_layers, block2_layers, skip_connections):
    # Hoist bias reads out of the unrolled layer loops.
    bin_v = bin_ref[...]         # (1, H)      f32
    b1_v = b1_ref[...]           # (L1, 1, H)  f32
    b2_v = b2_ref[...]           # (L2, 1, H)  f32
    bout_v = bout_ref[...]       # (1, OUTP)   f32

    def dense(a, w, b):
        # Matmul operands in the (possibly bf16) weight dtype; accumulate in f32.
        return jnp.dot(a.astype(w.dtype), w,
                       preferred_element_type=jnp.float32) + b

    x = x_ref[...]

    # input layer + activation
    h = _gelu(dense(x, win_ref[...], bin_v))

    # block 1 (dropout == identity at inference); intermediates stay as values
    b1 = h
    for l in range(block1_layers):
        b1 = _gelu(dense(b1, w1_ref[l], b1_v[l]))
    if skip_connections:
        b1 = b1 + h

    # block 2
    b2 = b1
    for l in range(block2_layers):
        b2 = _gelu(dense(b2, w2_ref[l], b2_v[l]))
    if skip_connections:
        b2 = b2 + b1

    # output layer (no activation); output columns are lane-padded to >=128
    o_ref[...] = dense(b2, wout_ref[...], bout_v).astype(o_ref.dtype)


# -------------------------------- wrapper ----------------------------------

def mlp_forward(x, params, *, block1_layers, block2_layers,
                skip_connections=True, compute_dtype=jnp.float32,
                batch_tile=None):
    """x: (batch, num_in) f32.  params: dict of pre-transposed f32 weights.

    compute_dtype: dtype of the matmul operands (jnp.bfloat16 recommended on
    v6e/v7x); bias add, GELU and accumulation stay float32.
    """
    batch, num_in = x.shape
    hidden = params["win"].shape[1]
    num_out = params["wout"].shape[1]

    # ---- tiling / padding ----------------------------------------------------
    # Batch tile: multiple of 8 sublanes; 256 rows per step feeds the 256x256
    # MXU on v6e/v7x (128 is fine on v5e).
    tb = batch_tile if batch_tile is not None else min(256, _round_up(batch, 8))
    tb = _round_up(tb, 8)
    padded_batch = _round_up(batch, tb)
    # Lane-dense output: pad num_out up to a multiple of 128.
    out_pad = _round_up(num_out, 128)

    x_p = x if padded_batch == batch else jnp.pad(
        x, ((0, padded_batch - batch), (0, 0)))
    wout_p = params["wout"] if out_pad == num_out else jnp.pad(
        params["wout"], ((0, 0), (0, out_pad - num_out)))
    bout_p = params["bout"] if out_pad == num_out else jnp.pad(
        params["bout"], ((0, 0), (0, out_pad - num_out)))

    # Keep a dummy layer when a block is empty so BlockSpec shapes stay
    # non-zero; the unrolled kernel loop never reads it.
    def _stack_or_dummy(w, b):
        if w.shape[0] == 0:
            return (jnp.zeros((1, hidden, hidden), jnp.float32),
                    jnp.zeros((1, 1, hidden), jnp.float32))
        return w, b

    w1, b1 = _stack_or_dummy(params["w1"], params["b1"])
    w2, b2 = _stack_or_dummy(params["w2"], params["b2"])

    # Matmul operands in compute_dtype (halves weight VMEM/HBM traffic in bf16).
    cd = jnp.dtype(compute_dtype)
    win = params["win"].astype(cd)
    w1 = w1.astype(cd)
    w2 = w2.astype(cd)
    wout_p = wout_p.astype(cd)
    bin_ = params["bin"]

    grid = (padded_batch // tb,)

    def const2(i):
        return (0, 0)

    def const3(i):
        return (0, 0, 0)

    in_specs = [
        pl.BlockSpec((tb, num_in), lambda i: (i, 0)),    # x: batch-tiled
        pl.BlockSpec((num_in, hidden), const2),          # win: VMEM-resident
        pl.BlockSpec((1, hidden), const2),               # bin
        pl.BlockSpec(w1.shape, const3),                  # block1 weight stack
        pl.BlockSpec(b1.shape, const3),                  # block1 bias stack
        pl.BlockSpec(w2.shape, const3),                  # block2 weight stack
        pl.BlockSpec(b2.shape, const3),                  # block2 bias stack
        pl.BlockSpec((hidden, out_pad), const2),         # wout (lane-padded)
        pl.BlockSpec((1, out_pad), const2),              # bout (lane-padded)
    ]
    out_specs = pl.BlockSpec((tb, out_pad), lambda i: (i, 0))

    # Rough VMEM budget: double-buffered batch tiles + resident weights/biases.
    nbytes = lambda a: a.size * a.dtype.itemsize
    weight_bytes = (nbytes(win) + nbytes(w1) + nbytes(w2) + nbytes(wout_p)
                    + nbytes(bin_) + nbytes(b1) + nbytes(b2) + nbytes(bout_p))
    tile_bytes = 2 * (tb * num_in + tb * out_pad) * 4
    vmem_limit = int(min(64 * 2**20,
                         max(16 * 2**20, 2 * weight_bytes + 2 * tile_bytes + (4 << 20))))

    kernel = functools.partial(
        _mlp_kernel,
        block1_layers=block1_layers,
        block2_layers=block2_layers,
        skip_connections=skip_connections,
    )

    out_padded = pl.pallas_call(
        kernel,
        out_shape=jax.ShapeDtypeStruct((padded_batch, out_pad), jnp.float32),
        grid_spec=pltpu.PrefetchScalarGridSpec(
            num_scalar_prefetch=0,
            grid=grid,
            in_specs=in_specs,
            out_specs=out_specs,
        ),
        compiler_params=pltpu.CompilerParams(
            dimension_semantics=("parallel",),   # v7x: shard batch tiles over 2 TCs
            vmem_limit_bytes=vmem_limit,
        ),
    )(x_p, win, bin_, w1, b1, w2, b2, wout_p, bout_p)

    return out_padded[:batch, :num_out]


# ------------------------- deterministic param init ------------------------

def init_mlp_params(key, num_in, num_out, hidden_size, block1_layers, block2_layers):
    """Kaiming-normal (fan_in, gain=sqrt(2)) weights, zero biases.
    Weights are stored transposed: (in_features, out_features)."""
    def kaiming(k, fan_in, fan_out):
        std = math.sqrt(2.0) / math.sqrt(fan_in)
        # sample as (out, in) like torch then transpose -> (in, out)
        return (std * jax.random.normal(k, (fan_out, fan_in), jnp.float32)).T

    keys = jax.random.split(key, 2 + block1_layers + block2_layers)
    ki = 0
    params = {}
    params["win"] = kaiming(keys[ki], num_in, hidden_size); ki += 1
    params["bin"] = jnp.zeros((1, hidden_size), jnp.float32)

    w1, b1 = [], []
    for _ in range(block1_layers):
        w1.append(kaiming(keys[ki], hidden_size, hidden_size)); ki += 1
        b1.append(jnp.zeros((1, hidden_size), jnp.float32))
    params["w1"] = jnp.stack(w1) if w1 else jnp.zeros((0, hidden_size, hidden_size), jnp.float32)
    params["b1"] = jnp.stack(b1) if b1 else jnp.zeros((0, 1, hidden_size), jnp.float32)

    w2, b2 = [], []
    for _ in range(block2_layers):
        w2.append(kaiming(keys[ki], hidden_size, hidden_size)); ki += 1
        b2.append(jnp.zeros((1, hidden_size), jnp.float32))
    params["w2"] = jnp.stack(w2) if w2 else jnp.zeros((0, hidden_size, hidden_size), jnp.float32)
    params["b2"] = jnp.stack(b2) if b2 else jnp.zeros((0, 1, hidden_size), jnp.float32)

    params["wout"] = kaiming(keys[ki], hidden_size, num_out); ki += 1
    params["bout"] = jnp.zeros((1, num_out), jnp.float32)
    return params


# ----------------------------- pure-JAX reference ---------------------------

def mlp_ref(x, params, *, block1_layers, block2_layers, skip_connections=True,
            approximate_gelu=False):
    gelu = lambda v: jax.nn.gelu(v, approximate=approximate_gelu)
    h = gelu(x @ params["win"] + params["bin"])
    b1 = h
    for l in range(block1_layers):
        b1 = gelu(b1 @ params["w1"][l] + params["b1"][l])
    if skip_connections:
        b1 = b1 + h
    b2 = b1
    for l in range(block2_layers):
        b2 = gelu(b2 @ params["w2"][l] + params["b2"][l])
    if skip_connections:
        b2 = b2 + b1
    return b2 @ params["wout"] + params["bout"]


# ---------------------------------- main ------------------------------------

if __name__ == "__main__":
    batch = 8
    num_in = 32
    num_out = 16
    hidden_size = 64
    block1_layers = 2
    block2_layers = 2

    key = jax.random.PRNGKey(0)
    kx, kp = jax.random.split(key)
    x = jax.random.normal(kx, (batch, num_in), jnp.float32)
    params = init_mlp_params(kp, num_in, num_out, hidden_size,
                             block1_layers, block2_layers)

    # --- f32-matmul path (tight validation) ---
    out = mlp_forward(x, params,
                      block1_layers=block1_layers,
                      block2_layers=block2_layers,
                      skip_connections=True,
                      compute_dtype=jnp.float32)
    out = jax.block_until_ready(out)
    assert out.shape == (batch, num_out)

    ref_tanh = mlp_ref(x, params, block1_layers=block1_layers,
                       block2_layers=block2_layers, skip_connections=True,
                       approximate_gelu=True)
    ref_exact = mlp_ref(x, params, block1_layers=block1_layers,
                        block2_layers=block2_layers, skip_connections=True,
                        approximate_gelu=False)

    # Tight check against the same (tanh) GELU formulation.
    assert jnp.allclose(out, ref_tanh, atol=1e-3, rtol=1e-3), \
        f"max abs err vs tanh-GELU ref {jnp.max(jnp.abs(out - ref_tanh))}"
    # Module semantics (exact-erf nn.GELU()): tanh approximation agrees to ~1e-2.
    assert jnp.allclose(out, ref_exact, atol=2e-2, rtol=2e-2), \
        f"max abs err vs exact-GELU ref {jnp.max(jnp.abs(out - ref_exact))}"

    # --- bf16-matmul path (v6e/v7x throughput config), loose numeric check ---
    out_bf16 = mlp_forward(x, params,
                           block1_layers=block1_layers,
                           block2_layers=block2_layers,
                           skip_connections=True,
                           compute_dtype=jnp.bfloat16)
    out_bf16 = jax.block_until_ready(out_bf16)
    assert out_bf16.shape == (batch, num_out)
    assert jnp.allclose(out_bf16, ref_exact, atol=1.5e-1, rtol=1e-1), \
        f"max abs err (bf16 path) {jnp.max(jnp.abs(out_bf16 - ref_exact))}"

    print("KERNEL_OK")
</pallas_src>

<mosaic_0001>
module attributes {stable_mosaic.version = 11 : i64} {
  func.func @_mlp_kernel(%arg0: i32, %arg1: memref<8x32xf32, #tpu.memory_space<vmem>>, %arg2: memref<32x64xf32, #tpu.memory_space<vmem>>, %arg3: memref<1x64xf32, #tpu.memory_space<vmem>>, %arg4: memref<2x64x64xf32, #tpu.memory_space<vmem>>, %arg5: memref<2x1x64xf32, #tpu.memory_space<vmem>>, %arg6: memref<2x64x64xf32, #tpu.memory_space<vmem>>, %arg7: memref<2x1x64xf32, #tpu.memory_space<vmem>>, %arg8: memref<64x128xf32, #tpu.memory_space<vmem>>, %arg9: memref<1x128xf32, #tpu.memory_space<vmem>>, %arg10: memref<8x128xf32, #tpu.memory_space<vmem>>) attributes {dimension_semantics = [#tpu.dimension_semantics<parallel>], iteration_bounds = array<i64: 1>, scalar_prefetch = 0 : i64, scratch_operands = 0 : i64, tpu.core_type = #tpu.core_type<tc>, window_params = [{transform_indices = @transform_0, window_bounds = array<i64: 8, 32>}, {pipeline_mode = #tpu.pipeline_mode<synchronous>, transform_indices = @transform_1, window_bounds = array<i64: 32, 64>}, {pipeline_mode = #tpu.pipeline_mode<synchronous>, transform_indices = @transform_2, window_bounds = array<i64: 1, 64>}, {pipeline_mode = #tpu.pipeline_mode<synchronous>, transform_indices = @transform_3, window_bounds = array<i64: 2, 64, 64>}, {pipeline_mode = #tpu.pipeline_mode<synchronous>, transform_indices = @transform_4, window_bounds = array<i64: 2, 1, 64>}, {pipeline_mode = #tpu.pipeline_mode<synchronous>, transform_indices = @transform_5, window_bounds = array<i64: 2, 64, 64>}, {pipeline_mode = #tpu.pipeline_mode<synchronous>, transform_indices = @transform_6, window_bounds = array<i64: 2, 1, 64>}, {pipeline_mode = #tpu.pipeline_mode<synchronous>, transform_indices = @transform_7, window_bounds = array<i64: 64, 128>}, {pipeline_mode = #tpu.pipeline_mode<synchronous>, transform_indices = @transform_8, window_bounds = array<i64: 1, 128>}, {transform_indices = @transform_9, window_bounds = array<i64: 8, 128>}]} {
    %c0 = arith.constant 0 : index
    %c0_0 = arith.constant 0 : index
    %0 = vector.load %arg3[%c0, %c0_0] : memref<1x64xf32, #tpu.memory_space<vmem>>, vector<1x64xf32>
    %c0_1 = arith.constant 0 : index
    %c0_2 = arith.constant 0 : index
    %c0_3 = arith.constant 0 : index
    %1 = vector.load %arg5[%c0_1, %c0_2, %c0_3] : memref<2x1x64xf32, #tpu.memory_space<vmem>>, vector<2x1x64xf32>
    %c0_4 = arith.constant 0 : index
    %c0_5 = arith.constant 0 : index
    %c0_6 = arith.constant 0 : index
    %2 = vector.load %arg7[%c0_4, %c0_5, %c0_6] : memref<2x1x64xf32, #tpu.memory_space<vmem>>, vector<2x1x64xf32>
    %c0_7 = arith.constant 0 : index
    %c0_8 = arith.constant 0 : index
    %3 = vector.load %arg9[%c0_7, %c0_8] : memref<1x128xf32, #tpu.memory_space<vmem>>, vector<1x128xf32>
    %c0_9 = arith.constant 0 : index
    %c0_10 = arith.constant 0 : index
    %4 = vector.load %arg1[%c0_9, %c0_10] : memref<8x32xf32, #tpu.memory_space<vmem>>, vector<8x32xf32>
    %c0_11 = arith.constant 0 : index
    %c0_12 = arith.constant 0 : index
    %5 = vector.load %arg2[%c0_11, %c0_12] : memref<32x64xf32, #tpu.memory_space<vmem>>, vector<32x64xf32>
    %cst = arith.constant dense<0.000000e+00> : vector<8x64xf32>
    %6 = tpu.matmul %4, %5, %cst {dimension_numbers = #tpu.dot_dimension_numbers<[1], [0], [0], [1], [0, 0, 1, 1], [], []>} : vector<8x32xf32>, vector<32x64xf32>, vector<8x64xf32> -> vector<8x64xf32>
    %7 = vector.broadcast %0 : vector<1x64xf32> to vector<8x64xf32>
    %8 = arith.addf %6, %7 : vector<8x64xf32>
    %cst_13 = arith.constant 5.000000e-01 : f32
    %9 = vector.broadcast %cst_13 : f32 to vector<8x64xf32>
    %10 = arith.mulf %9, %8 : vector<8x64xf32>
    %11 = arith.mulf %8, %8 : vector<8x64xf32>
    %12 = arith.mulf %11, %8 : vector<8x64xf32>
    %cst_14 = arith.constant 4.471500e-02 : f32
    %13 = vector.broadcast %cst_14 : f32 to vector<8x64xf32>
    %14 = arith.mulf %13, %12 : vector<8x64xf32>
    %15 = arith.addf %8, %14 : vector<8x64xf32>
    %cst_15 = arith.constant 0.797884583 : f32
    %16 = vector.broadcast %cst_15 : f32 to vector<8x64xf32>
    %17 = arith.mulf %16, %15 : vector<8x64xf32>
    %18 = math.tanh %17 : vector<8x64xf32>
    %cst_16 = arith.constant 1.000000e+00 : f32
    %19 = vector.broadcast %cst_16 : f32 to vector<8x64xf32>
    %20 = arith.addf %19, %18 : vector<8x64xf32>
    %21 = arith.mulf %10, %20 : vector<8x64xf32>
    %c0_17 = arith.constant 0 : index
    %c0_18 = arith.constant 0 : index
    %c0_19 = arith.constant 0 : index
    %22 = vector.load %arg4[%c0_17, %c0_18, %c0_19] : memref<2x64x64xf32, #tpu.memory_space<vmem>>, vector<1x64x64xf32>
    %23 = vector.shape_cast %22 : vector<1x64x64xf32> to vector<64x64xf32>
    %24 = vector.extract_strided_slice %1 {offsets = [0, 0, 0], sizes = [1, 1, 64], strides = [1, 1, 1]} : vector<2x1x64xf32> to vector<1x1x64xf32>
    %25 = vector.shape_cast %24 : vector<1x1x64xf32> to vector<1x64xf32>
    %cst_20 = arith.constant dense<0.000000e+00> : vector<8x64xf32>
    %26 = tpu.matmul %21, %23, %cst_20 {dimension_numbers = #tpu.dot_dimension_numbers<[1], [0], [0], [1], [0, 0, 1, 1], [], []>} : vector<8x64xf32>, vector<64x64xf32>, vector<8x64xf32> -> vector<8x64xf32>
    %27 = vector.broadcast %25 : vector<1x64xf32> to vector<8x64xf32>
    %28 = arith.addf %26, %27 : vector<8x64xf32>
    %cst_21 = arith.constant 5.000000e-01 : f32
    %29 = vector.broadcast %cst_21 : f32 to vector<8x64xf32>
    %30 = arith.mulf %29, %28 : vector<8x64xf32>
    %31 = arith.mulf %28, %28 : vector<8x64xf32>
    %32 = arith.mulf %31, %28 : vector<8x64xf32>
    %cst_22 = arith.constant 4.471500e-02 : f32
    %33 = vector.broadcast %cst_22 : f32 to vector<8x64xf32>
    %34 = arith.mulf %33, %32 : vector<8x64xf32>
    %35 = arith.addf %28, %34 : vector<8x64xf32>
    %cst_23 = arith.constant 0.797884583 : f32
    %36 = vector.broadcast %cst_23 : f32 to vector<8x64xf32>
    %37 = arith.mulf %36, %35 : vector<8x64xf32>
    %38 = math.tanh %37 : vector<8x64xf32>
    %cst_24 = arith.constant 1.000000e+00 : f32
    %39 = vector.broadcast %cst_24 : f32 to vector<8x64xf32>
    %40 = arith.addf %39, %38 : vector<8x64xf32>
    %41 = arith.mulf %30, %40 : vector<8x64xf32>
    %c1 = arith.constant 1 : index
    %c0_25 = arith.constant 0 : index
    %c0_26 = arith.constant 0 : index
    %42 = vector.load %arg4[%c1, %c0_25, %c0_26] : memref<2x64x64xf32, #tpu.memory_space<vmem>>, vector<1x64x64xf32>
    %43 = vector.shape_cast %42 : vector<1x64x64xf32> to vector<64x64xf32>
    %44 = vector.extract_strided_slice %1 {offsets = [1, 0, 0], sizes = [1, 1, 64], strides = [1, 1, 1]} : vector<2x1x64xf32> to vector<1x1x64xf32>
    %45 = vector.shape_cast %44 : vector<1x1x64xf32> to vector<1x64xf32>
    %cst_27 = arith.constant dense<0.000000e+00> : vector<8x64xf32>
    %46 = tpu.matmul %41, %43, %cst_27 {dimension_numbers = #tpu.dot_dimension_numbers<[1], [0], [0], [1], [0, 0, 1, 1], [], []>} : vector<8x64xf32>, vector<64x64xf32>, vector<8x64xf32> -> vector<8x64xf32>
    %47 = vector.broadcast %45 : vector<1x64xf32> to vector<8x64xf32>
    %48 = arith.addf %46, %47 : vector<8x64xf32>
    %cst_28 = arith.constant 5.000000e-01 : f32
    %49 = vector.broadcast %cst_28 : f32 to vector<8x64xf32>
    %50 = arith.mulf %49, %48 : vector<8x64xf32>
    %51 = arith.mulf %48, %48 : vector<8x64xf32>
    %52 = arith.mulf %51, %48 : vector<8x64xf32>
    %cst_29 = arith.constant 4.471500e-02 : f32
    %53 = vector.broadcast %cst_29 : f32 to vector<8x64xf32>
    %54 = arith.mulf %53, %52 : vector<8x64xf32>
    %55 = arith.addf %48, %54 : vector<8x64xf32>
    %cst_30 = arith.constant 0.797884583 : f32
    %56 = vector.broadcast %cst_30 : f32 to vector<8x64xf32>
    %57 = arith.mulf %56, %55 : vector<8x64xf32>
    %58 = math.tanh %57 : vector<8x64xf32>
    %cst_31 = arith.constant 1.000000e+00 : f32
    %59 = vector.broadcast %cst_31 : f32 to vector<8x64xf32>
    %60 = arith.addf %59, %58 : vector<8x64xf32>
    %61 = arith.mulf %50, %60 : vector<8x64xf32>
    %62 = arith.addf %61, %21 : vector<8x64xf32>
    %c0_32 = arith.constant 0 : index
    %c0_33 = arith.constant 0 : index
    %c0_34 = arith.constant 0 : index
    %63 = vector.load %arg6[%c0_32, %c0_33, %c0_34] : memref<2x64x64xf32, #tpu.memory_space<vmem>>, vector<1x64x64xf32>
    %64 = vector.shape_cast %63 : vector<1x64x64xf32> to vector<64x64xf32>
    %65 = vector.extract_strided_slice %2 {offsets = [0, 0, 0], sizes = [1, 1, 64], strides = [1, 1, 1]} : vector<2x1x64xf32> to vector<1x1x64xf32>
    %66 = vector.shape_cast %65 : vector<1x1x64xf32> to vector<1x64xf32>
    %cst_35 = arith.constant dense<0.000000e+00> : vector<8x64xf32>
    %67 = tpu.matmul %62, %64, %cst_35 {dimension_numbers = #tpu.dot_dimension_numbers<[1], [0], [0], [1], [0, 0, 1, 1], [], []>} : vector<8x64xf32>, vector<64x64xf32>, vector<8x64xf32> -> vector<8x64xf32>
    %68 = vector.broadcast %66 : vector<1x64xf32> to vector<8x64xf32>
    %69 = arith.addf %67, %68 : vector<8x64xf32>
    %cst_36 = arith.constant 5.000000e-01 : f32
    %70 = vector.broadcast %cst_36 : f32 to vector<8x64xf32>
    %71 = arith.mulf %70, %69 : vector<8x64xf32>
    %72 = arith.mulf %69, %69 : vector<8x64xf32>
    %73 = arith.mulf %72, %69 : vector<8x64xf32>
    %cst_37 = arith.constant 4.471500e-02 : f32
    %74 = vector.broadcast %cst_37 : f32 to vector<8x64xf32>
    %75 = arith.mulf %74, %73 : vector<8x64xf32>
    %76 = arith.addf %69, %75 : vector<8x64xf32>
    %cst_38 = arith.constant 0.797884583 : f32
    %77 = vector.broadcast %cst_38 : f32 to vector<8x64xf32>
    %78 = arith.mulf %77, %76 : vector<8x64xf32>
    %79 = math.tanh %78 : vector<8x64xf32>
    %cst_39 = arith.constant 1.000000e+00 : f32
    %80 = vector.broadcast %cst_39 : f32 to vector<8x64xf32>
    %81 = arith.addf %80, %79 : vector<8x64xf32>
    %82 = arith.mulf %71, %81 : vector<8x64xf32>
    %c1_40 = arith.constant 1 : index
    %c0_41 = arith.constant 0 : index
    %c0_42 = arith.constant 0 : index
    %83 = vector.load %arg6[%c1_40, %c0_41, %c0_42] : memref<2x64x64xf32, #tpu.memory_space<vmem>>, vector<1x64x64xf32>
    %84 = vector.shape_cast %83 : vector<1x64x64xf32> to vector<64x64xf32>
    %85 = vector.extract_strided_slice %2 {offsets = [1, 0, 0], sizes = [1, 1, 64], strides = [1, 1, 1]} : vector<2x1x64xf32> to vector<1x1x64xf32>
    %86 = vector.shape_cast %85 : vector<1x1x64xf32> to vector<1x64xf32>
    %cst_43 = arith.constant dense<0.000000e+00> : vector<8x64xf32>
    %87 = tpu.matmul %82, %84, %cst_43 {dimension_numbers = #tpu.dot_dimension_numbers<[1], [0], [0], [1], [0, 0, 1, 1], [], []>} : vector<8x64xf32>, vector<64x64xf32>, vector<8x64xf32> -> vector<8x64xf32>
    %88 = vector.broadcast %86 : vector<1x64xf32> to vector<8x64xf32>
    %89 = arith.addf %87, %88 : vector<8x64xf32>
    %cst_44 = arith.constant 5.000000e-01 : f32
    %90 = vector.broadcast %cst_44 : f32 to vector<8x64xf32>
    %91 = arith.mulf %90, %89 : vector<8x64xf32>
    %92 = arith.mulf %89, %89 : vector<8x64xf32>
    %93 = arith.mulf %92, %89 : vector<8x64xf32>
    %cst_45 = arith.constant 4.471500e-02 : f32
    %94 = vector.broadcast %cst_45 : f32 to vector<8x64xf32>
    %95 = arith.mulf %94, %93 : vector<8x64xf32>
    %96 = arith.addf %89, %95 : vector<8x64xf32>
    %cst_46 = arith.constant 0.797884583 : f32
    %97 = vector.broadcast %cst_46 : f32 to vector<8x64xf32>
    %98 = arith.mulf %97, %96 : vector<8x64xf32>
    %99 = math.tanh %98 : vector<8x64xf32>
    %cst_47 = arith.constant 1.000000e+00 : f32
    %100 = vector.broadcast %cst_47 : f32 to vector<8x64xf32>
    %101 = arith.addf %100, %99 : vector<8x64xf32>
    %102 = arith.mulf %91, %101 : vector<8x64xf32>
    %103 = arith.addf %102, %62 : vector<8x64xf32>
    %c0_48 = arith.constant 0 : index
    %c0_49 = arith.constant 0 : index
    %104 = vector.load %arg8[%c0_48, %c0_49] : memref<64x128xf32, #tpu.memory_space<vmem>>, vector<64x128xf32>
    %cst_50 = arith.constant dense<0.000000e+00> : vector<8x128xf32>
    %105 = tpu.matmul %103, %104, %cst_50 {dimension_numbers = #tpu.dot_dimension_numbers<[1], [0], [0], [1], [0, 0, 1, 1], [], []>} : vector<8x64xf32>, vector<64x128xf32>, vector<8x128xf32> -> vector<8x128xf32>
    %106 = vector.broadcast %3 : vector<1x128xf32> to vector<8x128xf32>
    %107 = arith.addf %105, %106 : vector<8x128xf32>
    %c0_51 = arith.constant 0 : index
    %c0_52 = arith.constant 0 : index
    %108 = vector.load %arg10[%c0_51, %c0_52] : memref<8x128xf32, #tpu.memory_space<vmem>>, vector<8x128xf32>
    tpu.vector_store %arg10[%c0_51, %c0_52], %107 {strides = array<i32>} : memref<8x128xf32, #tpu.memory_space<vmem>>, vector<8x128xf32>,
    return
  }
  func.func @transform_0(%arg0: i32) -> (i32, i32) {
    %c0_i32 = arith.constant 0 : i32
    %c0_i32_0 = arith.constant 0 : i32
    return %arg0, %c0_i32 : i32, i32
  }
  func.func @transform_1(%arg0: i32) -> (i32, i32) {
    %c0_i32 = arith.constant 0 : i32
    %c0_i32_0 = arith.constant 0 : i32
    %c0_i32_1 = arith.constant 0 : i32
    return %c0_i32, %c0_i32_0 : i32, i32
  }
  func.func @transform_2(%arg0: i32) -> (i32, i32) {
    %c0_i32 = arith.constant 0 : i32
    %c0_i32_0 = arith.constant 0 : i32
    %c0_i32_1 = arith.constant 0 : i32
    return %c0_i32, %c0_i32_0 : i32, i32
  }
  func.func @transform_3(%arg0: i32) -> (i32, i32, i32) {
    %c0_i32 = arith.constant 0 : i32
    %c0_i32_0 = arith.constant 0 : i32
    %c0_i32_1 = arith.constant 0 : i32
    %c0_i32_2 = arith.constant 0 : i32
    return %c0_i32, %c0_i32_0, %c0_i32_1 : i32, i32, i32
  }
  func.func @transform_4(%arg0: i32) -> (i32, i32, i32) {
    %c0_i32 = arith.constant 0 : i32
    %c0_i32_0 = arith.constant 0 : i32
    %c0_i32_1 = arith.constant 0 : i32
    %c0_i32_2 = arith.constant 0 : i32
    return %c0_i32, %c0_i32_0, %c0_i32_1 : i32, i32, i32
  }
  func.func @transform_5(%arg0: i32) -> (i32, i32, i32) {
    %c0_i32 = arith.constant 0 : i32
    %c0_i32_0 = arith.constant 0 : i32
    %c0_i32_1 = arith.constant 0 : i32
    %c0_i32_2 = arith.constant 0 : i32
    return %c0_i32, %c0_i32_0, %c0_i32_1 : i32, i32, i32
  }
  func.func @transform_6(%arg0: i32) -> (i32, i32, i32) {
    %c0_i32 = arith.constant 0 : i32
    %c0_i32_0 = arith.constant 0 : i32
    %c0_i32_1 = arith.constant 0 : i32
    %c0_i32_2 = arith.constant 0 : i32
    return %c0_i32, %c0_i32_0, %c0_i32_1 : i32, i32, i32
  }
  func.func @transform_7(%arg0: i32) -> (i32, i32) {
    %c0_i32 = arith.constant 0 : i32
    %c0_i32_0 = arith.constant 0 : i32
    %c0_i32_1 = arith.constant 0 : i32
    return %c0_i32, %c0_i32_0 : i32, i32
  }
  func.func @transform_8(%arg0: i32) -> (i32, i32) {
    %c0_i32 = arith.constant 0 : i32
    %c0_i32_0 = arith.constant 0 : i32
    %c0_i32_1 = arith.constant 0 : i32
    return %c0_i32, %c0_i32_0 : i32, i32
  }
  func.func @transform_9(%arg0: i32) -> (i32, i32) {
    %c0_i32 = arith.constant 0 : i32
    %c0_i32_0 = arith.constant 0 : i32
    return %arg0, %c0_i32 : i32, i32
  }
}

</mosaic_0001>

<bundles_post_ra>
// kernel: tpu_custom_call.1
= control target key start
LH: loop header
LB: loop body
LE: loop exit
PB: predicated region body
PF: predicated region fallthrough
CT: control target
= control target key end

     0   :  { %14 = vsyncpa [#allocation3], 0  ;;  %s1298_s0 = inlined_call_operand.hbm [shape: f32[8,32], index: 0, kind: input, shape index: {}]   ;;  %s1299_s1 = inlined_call_operand.hbm [shape: f32[32,64], index: 1, kind: input, shape index: {}]   ;;  %s1300_s2 = inlined_call_operand.vmem [shape: f32[1,64], index: 2, kind: input, shape index: {}]   ;;  %s1301_s3 = inlined_call_operand.hbm [shape: f32[2,64,64], index: 3, kind: input, shape index: {}]   ;;  %s1302_s4 = inlined_call_operand.vmem [shape: f32[2,1,64], index: 4, kind: input, shape index: {}]   ;;  %s1303_s5 = inlined_call_operand.hbm [shape: f32[2,64,64], index: 5, kind: input, shape index: {}]   ;;  %s1304_s6 = inlined_call_operand.vmem [shape: f32[2,1,64], index: 6, kind: input, shape index: {}]   ;;  %s1305_s7 = inlined_call_operand.hbm [shape: f32[64,128], index: 7, kind: input, shape index: {}]   ;;  %s1306_s8 = inlined_call_operand.vmem [shape: f32[1,128], index: 8, kind: input, shape index: {}]   ;;  %s1307_s9 = inlined_call_operand.hbm [shape: f32[8,128], index: 9, kind: output, shape index: {}]  }
   0x1   :  { %15 = vsyncpa [#allocation6], 0 }
   0x2   :  { %16 = vsyncpa [#allocation9], 0 }
   0x3   :  { %17 = vsyncpa [#allocation4], 0  ;;  %s1088_s30 = smov [#allocation5]   ;;  %s948_s13 = scalar_lea.hbm %s1299_s1, 512 }
   0x4   :  { %s33_s10 = sshll.u32 %s1088_s30, 4  ;;  %p949_p0 = scmp.ne.s32.totalorder %s1299_s1, %s948_s13  ;;  %s34_s10 = int_to_ptr.vmem [resolvable:$true] %s33_s10 }
   0x5   :  { %p952_p1 = scmp.lt.u32.totalorder %s948_s13, %s1299_s1 }
   0x7   :  { %p954_p2 = pnand %p952_p1, %p949_p0 }
   0x9   :  { %957 = shalt.err (!%p954_p2)
}
   0xa   :  { %s958_s18 = scalar_lea.vmem %s34_s10, 512  ;;  %p963_p4 = scmp.lt.s32.totalorder %s34_s10, %s34_s10 }
   0xb   :  { %p959_p3 = scmp.ne.s32.totalorder %s34_s10, %s958_s18  ;;  %p964_p5 = scmp.lt.s32.totalorder %s958_s18, %s958_s18 }
   0xd   :  { %p965_p6 = por %p964_p5, %p963_p4 }
   0xf   :  { %p966_p7 = pnand %p965_p6, %p959_p3 }
  0x11   :  { %969 = shalt.err (!%p966_p7)
}
  0x12   :  { %s1089_s19 = smov 128   ;;  %s1090_s20 = smov 8  }
  0x13   :  { %39 = dma.hbm_to_vmem [thread:$0]  %s1299_s1, 512, %s34_s10, [#allocation6], %s1089_s19, %s1089_s19, %s1090_s20  }
  0x14   :  { %s1091_s23 = smov [#allocation8]   ;;  %s1092_s25 = smov [#allocation2]  }
  0x15   :  { %s61_s24 = sshll.u32 %s1091_s23, 4  ;;  %s24_s26 = sshll.u32 %s1092_s25, 4  ;;  %s62_s24 = int_to_ptr.vmem [resolvable:$true] %s61_s24  ;;  %s25_s26 = int_to_ptr.vmem [resolvable:$true] %s24_s26 }
  0x16   :  { %s970_s29 = scalar_lea.hbm %s1303_s5, 2048 }
  0x17   :  { %p971_p8 = scmp.ne.s32.totalorder %s1303_s5, %s970_s29  ;;  %p974_p9 = scmp.lt.u32.totalorder %s970_s29, %s1303_s5 }
  0x19   :  { %p976_p10 = pnand %p974_p9, %p971_p8 }
  0x1b   :  { %979 = shalt.err (!%p976_p10)
}
  0x1c   :  { %s980_s1 = scalar_lea.vmem %s62_s24, 2048  ;;  %p985_p12 = scmp.lt.s32.totalorder %s62_s24, %s62_s24 }
  0x1d   :  { %p981_p11 = scmp.ne.s32.totalorder %s62_s24, %s980_s1  ;;  %p986_p13 = scmp.lt.s32.totalorder %s980_s1, %s980_s1 }
  0x1f   :  { %p987_p0 = por %p986_p13, %p985_p12 }
  0x21   :  { %p988_p1 = pnand %p987_p0, %p981_p11 }
  0x23   :  { %991 = shalt.err (!%p988_p1)
}
  0x24   :  { %67 = dma.hbm_to_vmem [thread:$0]  %s1303_s5, 2048, %s62_s24, [#allocation9], %s1089_s19, %s1089_s19, %s1090_s20  }
  0x25   :  { %s992_s17 = scalar_lea.hbm %s1298_s0, 128 }
  0x26   :  { %p993_p2 = scmp.ne.s32.totalorder %s1298_s0, %s992_s17  ;;  %p996_p3 = scmp.lt.u32.totalorder %s992_s17, %s1298_s0 }
  0x28   :  { %p998_p4 = pnand %p996_p3, %p993_p2 }
  0x2a   :  { %1001 = shalt.err (!%p998_p4)
}
  0x2b   :  { %s1002_s25 = scalar_lea.vmem %s25_s26, 128  ;;  %p1007_p6 = scmp.lt.s32.totalorder %s25_s26, %s25_s26 }
  0x2c   :  { %p1003_p5 = scmp.ne.s32.totalorder %s25_s26, %s1002_s25  ;;  %p1008_p7 = scmp.lt.s32.totalorder %s1002_s25, %s1002_s25 }
  0x2e   :  { %p1009_p8 = por %p1008_p7, %p1007_p6 }
  0x30   :  { %p1010_p9 = pnand %p1009_p8, %p1003_p5 }
  0x32   :  { %1013 = shalt.err (!%p1010_p9)
}
  0x33   :  { %27 = dma.hbm_to_vmem [thread:$0]  %s1298_s0, 128, %s25_s26, [#allocation3]  }
  0x34   :  { %s1093_s27 = smov [#allocation7]   ;;  %s1094_s29 = smov [#allocation10]  }
  0x35   :  { %s47_s28 = sshll.u32 %s1093_s27, 4  ;;  %s75_s30 = sshll.u32 %s1094_s29, 4  ;;  %s48_s28 = int_to_ptr.vmem [resolvable:$true] %s47_s28  ;;  %s76_s30 = int_to_ptr.vmem [resolvable:$true] %s75_s30 }
  0x36   :  { %s1014_s13 = scalar_lea.hbm %s1301_s3, 2048 }
  0x37   :  { %p1015_p10 = scmp.ne.s32.totalorder %s1301_s3, %s1014_s13  ;;  %p1018_p11 = scmp.lt.u32.totalorder %s1014_s13, %s1301_s3 }
  0x39   :  { %p1020_p12 = pnand %p1018_p11, %p1015_p10 }
  0x3b   :  { %1023 = shalt.err (!%p1020_p12)
}
  0x3c   :  { %s1024_s0 = scalar_lea.vmem %s48_s28, 2048  ;;  %p1029_p0 = scmp.lt.s32.totalorder %s48_s28, %s48_s28 }
  0x3d   :  { %p1025_p13 = scmp.ne.s32.totalorder %s48_s28, %s1024_s0  ;;  %p1030_p1 = scmp.lt.s32.totalorder %s1024_s0, %s1024_s0 }
  0x3f   :  { %p1031_p2 = por %p1030_p1, %p1029_p0 }
  0x41   :  { %p1032_p3 = pnand %p1031_p2, %p1025_p13 }
  0x43   :  { %1035 = shalt.err (!%p1032_p3)
}
  0x44   :  { %53 = dma.hbm_to_vmem [thread:$0]  %s1301_s3, 2048, %s48_s28, [#allocation6], %s1089_s19, %s1089_s19, %s1090_s20  }
  0x45   :  { %s1036_s21 = scalar_lea.hbm %s1305_s7, 1024 }
  0x46   :  { %p1037_p4 = scmp.ne.s32.totalorder %s1305_s7, %s1036_s21  ;;  %p1040_p5 = scmp.lt.u32.totalorder %s1036_s21, %s1305_s7 }
  0x48   :  { %p1042_p6 = pnand %p1040_p5, %p1037_p4 }
  0x4a   :  { %1045 = shalt.err (!%p1042_p6)
}
  0x4b   :  { %s1046_s24 = scalar_lea.vmem %s76_s30, 1024  ;;  %p1051_p8 = scmp.lt.s32.totalorder %s76_s30, %s76_s30 }
  0x4c   :  { %p1047_p7 = scmp.ne.s32.totalorder %s76_s30, %s1046_s24  ;;  %p1052_p9 = scmp.lt.s32.totalorder %s1046_s24, %s1046_s24 }
  0x4e   :  { %p1053_p10 = por %p1052_p9, %p1051_p8 }
  0x50   :  { %p1054_p11 = pnand %p1053_p10, %p1047_p7 }
  0x52   :  { %1057 = shalt.err (!%p1054_p11)
}
  0x53   :  { %81 = dma.hbm_to_vmem [thread:$0]  %s1305_s7, 1024, %s76_s30, [#allocation9], %s1089_s19, %s1089_s19, %s1090_s20  }
  0x54   :  { %1080 = dma.done.wait [#allocation3], 128  }
  0x55   :  { %1081 = vsyncadd [#allocation3], 4294967168 }
  0x56   :  { %1082 = dma.done.wait [#allocation6], 2560  }
  0x57   :  { %1083 = vsyncadd [#allocation6], 4294964736 }
  0x58   :  { %1084 = dma.done.wait [#allocation9], 3072  }
  0x59   :  { %1085 = vsyncadd [#allocation9], 4294964224  ;;  %v1095_v0 = vmov 0.0|0.0   ;;  %vm1096_vm0 = vmmov 0   ;;  %v1097_v1 = vmov 0.0   ;;  %v106_v2 = vld [vmem:[#allocation5] sm:$0xff] }
  0x5a   :  { %861 = vmatprep.subr.bf16.mxu0 %v1095_v0  ;;  %763 = vmatprep.mubr.msk.f32.mxu0 %vm1096_vm0, %v1097_v1  ;;  %v107_v3 = vld [vmem:[#allocation5 + $0x8] sm:$0xff]  ;;  %v108_v4 = vld [vmem:[#allocation5 + $0x10] sm:$0xff]  ;;  %v109_v6 = vld [vmem:[#allocation5 + $0x18] sm:$0xff]  ;;  %vm116_vm1 = vcmask 261120   ;;  %vm213_vm2 = vcmask 523264  }
  0x5b   :  { %867 = vmatprep.subr.bf16.mxu1 %v1095_v0  ;;  %782 = vmatprep.mubr.msk.f32.mxu1 %vm1096_vm0, %v1097_v1  ;;  %v862_v5 = vpack.c.bf16 %v107_v3, %v106_v2  ;;  %v865_v7 = vpack.c.bf16 %v109_v6, %v108_v4  ;;  %v105_v8 = vld [vmem:[#allocation2] sm:$0xff]  ;;  %v199_v9 = vld [vmem:[#allocation7] sm:$0xff]  ;;  %v200_v10 = vld [vmem:[#allocation7 + $0x8] sm:$0xff] }
  0x5c   :  { %v868_v11 = vpack.c.bf16 %v200_v10, %v199_v9  ;;  %v201_v12 = vld [vmem:[#allocation7 + $0x10] sm:$0xff]  ;;  %v202_v13 = vld [vmem:[#allocation7 + $0x18] sm:$0xff]  ;;  %v203_v15 = vld [vmem:[#allocation7 + $0x20] sm:$0xff] }
  0x5d   :  { %863 = vmatpush3.bf16.msra.mxu0 %v862_v5  ;;  %v871_v14 = vpack.c.bf16 %v202_v13, %v201_v12  ;;  %v204_v16 = vld [vmem:[#allocation7 + $0x28] sm:$0xff]  ;;  %v205_v18 = vld [vmem:[#allocation7 + $0x30] sm:$0xff]  ;;  %v206_v19 = vld [vmem:[#allocation7 + $0x38] sm:$0xff] }
  0x5e   :  { %864 = vmatprep.subr.bf16.mxu0 %v1095_v0  ;;  %869 = vmatpush3.bf16.msra.mxu1 %v868_v11  ;;  %v874_v17 = vpack.c.bf16 %v204_v16, %v203_v15  ;;  %v877_v20 = vpack.c.bf16 %v206_v19, %v205_v18  ;;  %v693_v21 = vld [vmem:[%s1300_s2] ss:$0 sm:$0xff]  ;;  %v297_v34 = vld [vmem:[#allocation7 + $0x40] sm:$0xff]  ;;  %v298_v35 = vld [vmem:[#allocation7 + $0x48] sm:$0xff] }
  0x5f   :  { %870 = vmatprep.subr.bf16.mxu1 %v1095_v0  ;;  %v880_v36 = vpack.c.bf16 %v298_v35, %v297_v34  ;;  %v299_v37 = vld [vmem:[#allocation7 + $0x50] sm:$0xff]  ;;  %v300_v38 = vld [vmem:[#allocation7 + $0x58] sm:$0xff]  ;;  %v301_v40 = vld [vmem:[#allocation7 + $0x60] sm:$0xff] }
  0x60   :  { %v883_v39 = vpack.c.bf16 %v300_v38, %v299_v37  ;;  %v302_v41 = vld [vmem:[#allocation7 + $0x68] sm:$0xff]  ;;  %v303_v43 = vld [vmem:[#allocation7 + $0x70] sm:$0xff]  ;;  %v304_v44 = vld [vmem:[#allocation7 + $0x78] sm:$0xff] }
  0x61   :  { %866 = vmatpush3.bf16.msra.mxu0 %v865_v7  ;;  %v886_v42 = vpack.c.bf16 %v302_v41, %v301_v40  ;;  %v889_v45 = vpack.c.bf16 %v304_v44, %v303_v43  ;;  %v695_v46 = vld [vmem:[%s1302_s4] ss:$0 sm:$0xff]  ;;  %v394_v59 = vld [vmem:[#allocation8] sm:$0xff]  ;;  %v395_v60 = vld [vmem:[#allocation8 + $0x8] sm:$0xff] }
  0x62   :  { %879 = vmatprep.subr.bf16.mxu0 %v1095_v0  ;;  %872 = vmatpush3.bf16.msra.mxu1 %v871_v14  ;;  %v892_v61 = vpack.c.bf16 %v395_v60, %v394_v59  ;;  %v396_v62 = vld [vmem:[#allocation8 + $0x10] sm:$0xff]  ;;  %v397_v63 = vld [vmem:[#allocation8 + $0x18] sm:$0xff]  ;;  %v398_v3 = vld [vmem:[#allocation8 + $0x20] sm:$0xff] }
  0x63   :  { %873 = vmatprep.subr.bf16.mxu1 %v1095_v0  ;;  %v895_v2 = vpack.c.bf16 %v397_v63, %v396_v62  ;;  %v399_v4 = vld [vmem:[#allocation8 + $0x28] sm:$0xff]  ;;  %v400_v6 = vld [vmem:[#allocation8 + $0x30] sm:$0xff]  ;;  %v401_v7 = vld [vmem:[#allocation8 + $0x38] sm:$0xff] }
  0x64   :  { %764 = vmatmul.mubr.msk.f32.vlgmr.msra.gmra.mrb[0].mxu0 %vm116_vm1, %v105_v8  ;;  %v898_v5 = vpack.c.bf16 %v399_v4, %v398_v3  ;;  %v901_v8 = vpack.c.bf16 %v401_v7, %v400_v6  ;;  %v697_v9 = vld [vmem:[%s1302_s4 + $0x1] ss:$0 sm:$0xff]  ;;  %v699_v34 = vld [vmem:[%s1304_s6] ss:$0 sm:$0xff] }
  0x65   :  { %801 = vmatprep.mubr.msk.f32.mxu0 %vm1096_vm0, %v1097_v1  ;;  %881 = vmatpush3.bf16.msra.mxu0 %v880_v36  ;;  %v701_v59 = vld [vmem:[%s1304_s6 + $0x1] ss:$0 sm:$0xff]  ;;  %s1098_s6 = smov [#allocation11]  }
  0x66   :  { %875 = vmatpush3.bf16.msra.mxu1 %v874_v17  ;;  %882 = vmatprep.subr.bf16.mxu0 %v1095_v0  ;;  %s682_s10 = sshll.u32 %s1098_s6, 4  ;;  %s683_s10 = int_to_ptr.vmem [resolvable:$true] %s682_s10 }
  0x67   :  { %876 = vmatprep.subr.bf16.mxu1 %v1095_v0  ;;  %s1058_s14 = scalar_lea.vmem %s683_s10, 128  ;;  %p1063_p13 = scmp.lt.s32.totalorder %s683_s10, %s683_s10 }
  0x68   :  { %p1059_p12 = scmp.ne.s32.totalorder %s683_s10, %s1058_s14  ;;  %p1064_p0 = scmp.lt.s32.totalorder %s1058_s14, %s1058_s14 }
  0x69   :  { %884 = vmatpush3.bf16.msra.mxu0 %v883_v39 }
  0x6a   :  { %878 = vmatpush3.bf16.msra.mxu1 %v877_v20  ;;  %885 = vmatprep.subr.bf16.mxu0 %v1095_v0  ;;  %p1065_p1 = por %p1064_p0, %p1063_p13 }
  0x6b   :  { %891 = vmatprep.subr.bf16.mxu1 %v1095_v0 }
  0x6c   :  { %p1066_p2 = pnand %p1065_p1, %p1059_p12 }
  0x6d   :  { %887 = vmatpush3.bf16.msra.mxu0 %v886_v42 }
  0x6e   :  { %888 = vmatprep.subr.bf16.mxu0 %v1095_v0 }
  0x71   :  { %890 = vmatpush3.bf16.msra.mxu0 %v889_v45 }
  0x72   :  { %903 = vmatprep.subr.bf16.mxu0 %v1095_v0 }
 0x137   :  { %v186_v22 = vpop.f32.mrb[0].mxu0 }
 0x138   :  { %v187_v23 = vadd.f32 %v693_v21, %v186_v22  ;;  %v765_v24 = vpop.f32.mrb[1].mxu0 }
 0x139   :  { %v492_v24 = vld [vmem:[#allocation8 + $0x48] sm:$0xff] }
 0x13a   :  { %v191_v25 = vmul.f32 %v187_v23, %v187_v23  ;;  %v190_v31 = vmul.f32 0.5, %v187_v23 }
 0x13c   :  { %v192_v26 = vmul.f32 %v191_v25, %v187_v23 }
 0x13e   :  { %v193_v27 = vmul.f32 0.044715, %v192_v26  ;;  %v493_v26 = vld [vmem:[#allocation8 + $0x50] sm:$0xff] }
 0x140   :  { %v194_v28 = vadd.f32 %v193_v27, %v187_v23  ;;  %v491_v23 = vld [vmem:[#allocation8 + $0x40] sm:$0xff]  ;;  %v494_v27 = vld [vmem:[#allocation8 + $0x58] sm:$0xff] }
 0x141   :  { %v904_v25 = vpack.c.bf16 %v492_v24, %v491_v23 }
 0x142   :  { %v195_v29 = vmul.f32 0.7978846, %v194_v28  ;;  %v907_v28 = vpack.c.bf16 %v494_v27, %v493_v26 }
 0x144   :  { %938 = vtanh.f32 %v195_v29  ;;  %v495_v29 = vld [vmem:[#allocation8 + $0x60] sm:$0xff] }
 0x14e   :  { %v939_v30 = vpop.eup %938 }
 0x14f   :  { %v197_v32 = vadd.f32 1.0, %v939_v30  ;;  %v496_v30 = vld [vmem:[#allocation8 + $0x68] sm:$0xff] }
 0x151   :  { %v1238_v33 = vmul.f32 %v197_v32, %v190_v31  ;;  %v910_v31 = vpack.c.bf16 %v496_v30, %v495_v29  ;;  %v497_v32 = vld [vmem:[#allocation8 + $0x70] sm:$0xff] }
 0x153   :  { %783 = vmatmul.mubr.msk.f32.vlgmr.msra.gmra.mrb[0].mxu1 %vm213_vm2, %v1238_v33 }
 0x154   :  { %820 = vmatprep.mubr.msk.f32.mxu1 %vm1096_vm0, %v1097_v1  ;;  %893 = vmatpush3.bf16.msra.mxu1 %v892_v61 }
 0x155   :  { %894 = vmatprep.subr.bf16.mxu1 %v1095_v0 }
 0x158   :  { %896 = vmatpush3.bf16.msra.mxu1 %v895_v2 }
 0x159   :  { %897 = vmatprep.subr.bf16.mxu1 %v1095_v0 }
 0x15c   :  { %899 = vmatpush3.bf16.msra.mxu1 %v898_v5 }
 0x15d   :  { %900 = vmatprep.subr.bf16.mxu1 %v1095_v0 }
 0x160   :  { %902 = vmatpush3.bf16.msra.mxu1 %v901_v8 }
 0x161   :  { %915 = vmatprep.subr.bf16.mxu1 %v1095_v0 }
 0x226   :  { %v283_v47 = vpop.f32.mrb[0].mxu1 }
 0x227   :  { %v284_v48 = vadd.f32 %v695_v46, %v283_v47  ;;  %v784_v49 = vpop.f32.mrb[1].mxu1  ;;  %v588_v47 = vld [vmem:[#allocation10] sm:$0xff] }
 0x229   :  { %v288_v50 = vmul.f32 %v284_v48, %v284_v48  ;;  %v287_v56 = vmul.f32 0.5, %v284_v48 }
 0x22b   :  { %v289_v51 = vmul.f32 %v288_v50, %v284_v48  ;;  %v590_v50 = vld [vmem:[#allocation10 + $0x10] sm:$0xff] }
 0x22d   :  { %v290_v52 = vmul.f32 0.044715, %v289_v51  ;;  %v591_v51 = vld [vmem:[#allocation10 + $0x18] sm:$0xff] }
 0x22f   :  { %v291_v53 = vadd.f32 %v290_v52, %v284_v48  ;;  %v589_v48 = vld [vmem:[#allocation10 + $0x8] sm:$0xff]  ;;  %v919_v52 = vpack.c.bf16 %v591_v51, %v590_v50 }
 0x230   :  { %v916_v49 = vpack.c.bf16 %v589_v48, %v588_v47 }
 0x231   :  { %v292_v54 = vmul.f32 0.7978846, %v291_v53  ;;  %v592_v53 = vld [vmem:[#allocation10 + $0x20] sm:$0xff] }
 0x233   :  { %940 = vtanh.f32 %v292_v54  ;;  %v593_v54 = vld [vmem:[#allocation10 + $0x28] sm:$0xff] }
 0x23d   :  { %v941_v55 = vpop.eup %940 }
 0x23e   :  { %v294_v57 = vadd.f32 1.0, %v941_v55  ;;  %v922_v55 = vpack.c.bf16 %v593_v54, %v592_v53 }
 0x240   :  { %v295_v58 = vmul.f32 %v294_v57, %v287_v56  ;;  %v594_v56 = vld [vmem:[#allocation10 + $0x30] sm:$0xff]  ;;  %v595_v57 = vld [vmem:[#allocation10 + $0x38] sm:$0xff] }
 0x242   :  { %802 = vmatmul.mubr.msk.f32.vlgmr.msra.gmra.mrb[2].mxu0 %vm213_vm2, %v295_v58  ;;  %v925_v58 = vpack.c.bf16 %v595_v57, %v594_v56 }
 0x243   :  { %839 = vmatprep.mubr.msk.f32.mxu0 %vm1096_vm0, %v1097_v1  ;;  %905 = vmatpush3.bf16.msra.mxu0 %v904_v25 }
 0x244   :  { %906 = vmatprep.subr.bf16.mxu0 %v1095_v0 }
 0x247   :  { %908 = vmatpush3.bf16.msra.mxu0 %v907_v28 }
 0x248   :  { %909 = vmatprep.subr.bf16.mxu0 %v1095_v0 }
 0x24b   :  { %911 = vmatpush3.bf16.msra.mxu0 %v910_v31 }
 0x24c   :  { %912 = vmatprep.subr.bf16.mxu0 %v1095_v0 }
 0x315   :  { %v380_v10 = vpop.f32.mrb[2].mxu0 }
 0x316   :  { %v381_v11 = vadd.f32 %v697_v9, %v380_v10  ;;  %v803_v12 = vpop.f32.mrb[3].mxu0  ;;  %v703_v10 = vld [vmem:[%s1306_s8] ss:$0 sm:$0xff] }
 0x318   :  { %v385_v13 = vmul.f32 %v381_v11, %v381_v11  ;;  %v384_v19 = vmul.f32 0.5, %v381_v11 }
 0x31a   :  { %v386_v14 = vmul.f32 %v385_v13, %v381_v11 }
 0x31c   :  { %v387_v15 = vmul.f32 0.044715, %v386_v14 }
 0x31e   :  { %v388_v16 = vadd.f32 %v387_v15, %v381_v11 }
 0x320   :  { %v389_v17 = vmul.f32 0.7978846, %v388_v16 }
 0x322   :  { %942 = vtanh.f32 %v389_v17 }
 0x32c   :  { %v943_v18 = vpop.eup %942 }
 0x32d   :  { %v391_v20 = vadd.f32 1.0, %v943_v18 }
 0x32f   :  { %v392_v21 = vmul.f32 %v391_v20, %v384_v19 }
 0x331   :  { %v1262_v22 = vadd.f32 %v392_v21, %v1238_v33 }
 0x333   :  { %821 = vmatmul.mubr.msk.f32.vlgmr.msra.gmra.mrb[2].mxu1 %vm213_vm2, %v1262_v22 }
 0x334   :  { %858 = vmatprep.mubr.msk.f32.mxu1 %vm1096_vm0, %v1097_v1  ;;  %v498_v1 = vld [vmem:[#allocation8 + $0x78] sm:$0xff]  ;;  %917 = vmatpush3.bf16.msra.mxu1 %v916_v49 }
 0x335   :  { %v913_v33 = vpack.c.bf16 %v498_v1, %v497_v32  ;;  %918 = vmatprep.subr.bf16.mxu1 %v1095_v0 }
 0x337   :  { %914 = vmatpush3.bf16.msra.mxu0 %v913_v33 }
 0x338   :  { %920 = vmatpush3.bf16.msra.mxu1 %v919_v52 }
 0x339   :  { %921 = vmatprep.subr.bf16.mxu1 %v1095_v0 }
 0x33c   :  { %923 = vmatpush3.bf16.msra.mxu1 %v922_v55 }
 0x33d   :  { %924 = vmatprep.subr.bf16.mxu1 %v1095_v0 }
 0x340   :  { %926 = vmatpush3.bf16.msra.mxu1 %v925_v58 }
 0x406   :  { %v477_v35 = vpop.f32.mrb[2].mxu1 }
 0x407   :  { %v478_v36 = vadd.f32 %v699_v34, %v477_v35  ;;  %v822_v37 = vpop.f32.mrb[3].mxu1 }
 0x409   :  { %v482_v38 = vmul.f32 %v478_v36, %v478_v36  ;;  %v481_v44 = vmul.f32 0.5, %v478_v36 }
 0x40b   :  { %v483_v39 = vmul.f32 %v482_v38, %v478_v36 }
 0x40d   :  { %v484_v40 = vmul.f32 0.044715, %v483_v39 }
 0x40f   :  { %v485_v41 = vadd.f32 %v484_v40, %v478_v36 }
 0x411   :  { %v486_v42 = vmul.f32 0.7978846, %v485_v41 }
 0x413   :  { %944 = vtanh.f32 %v486_v42 }
 0x41d   :  { %v945_v43 = vpop.eup %944 }
 0x41e   :  { %v488_v45 = vadd.f32 1.0, %v945_v43 }
 0x420   :  { %v489_v46 = vmul.f32 %v488_v45, %v481_v44 }
 0x422   :  { %840 = vmatmul.mubr.msk.f32.vlgmr.msra.gmra.mrb[4].mxu0 %vm213_vm2, %v489_v46 }
 0x4f5   :  { %v574_v60 = vpop.f32.mrb[4].mxu0 }
 0x4f6   :  { %v575_v61 = vadd.f32 %v701_v59, %v574_v60  ;;  %v841_v62 = vpop.f32.mrb[5].mxu0 }
 0x4f8   :  { %v579_v63 = vmul.f32 %v575_v61, %v575_v61  ;;  %v578_v7 = vmul.f32 0.5, %v575_v61 }
 0x4fa   :  { %v580_v2 = vmul.f32 %v579_v63, %v575_v61 }
 0x4fc   :  { %v581_v3 = vmul.f32 0.044715, %v580_v2 }
 0x4fe   :  { %v582_v4 = vadd.f32 %v581_v3, %v575_v61 }
 0x500   :  { %v583_v5 = vmul.f32 0.7978846, %v582_v4 }
 0x502   :  { %946 = vtanh.f32 %v583_v5 }
 0x50c   :  { %v947_v6 = vpop.eup %946 }
 0x50d   :  { %v585_v0 = vadd.f32 1.0, %v947_v6 }
 0x50f   :  { %v586_v8 = vmul.f32 %v585_v0, %v578_v7 }
 0x511   :  { %v587_v9 = vadd.f32 %v586_v8, %v1262_v22 }
 0x513   :  { %859 = vmatmul.mubr.msk.f32.vlgmr.msra.gmra.mrb[4].mxu1 %vm213_vm2, %v587_v9 }
 0x5e6   :  { %v671_v11 = vpop.f32.mrb[4].mxu1 }
 0x5e7   :  { %v672_v12 = vadd.f32 %v703_v10, %v671_v11  ;;  %v860_v13 = vpop.f32.mrb[5].mxu1 }
 0x5e9   :  { %675 = vst [vmem:[#allocation11] sm:$0xff] %v672_v12 }
 0x5ea   :  { %1069 = shalt.err (!%p1066_p2)
}
 0x5eb   :  { %s1070_s26 = scalar_lea.hbm %s1307_s9, 128 }
 0x5ec   :  { %p1071_p3 = scmp.ne.s32.totalorder %s1307_s9, %s1070_s26  ;;  %p1074_p4 = scmp.lt.u32.totalorder %s1070_s26, %s1307_s9 }
 0x5ee   :  { %p1076_p5 = pnand %p1074_p4, %p1071_p3 }
 0x5f0   :  { %1079 = shalt.err (!%p1076_p5)
}
 0x5f1   :  { %685 = dma.vmem_to_hbm [thread:$0]  %s683_s10, 128, %s1307_s9, [#allocation4]  }
 0x5f2   :  { %1086 = dma.done.wait [#allocation4], 128  }
 0x5f3   :  { %1087 = vsyncadd [#allocation4], 4294967168 }
 0x5f4   :  { %689 = vsyncpa [#allocation3], 1 }
 0x5f5   :  { %690 = vsyncpa [#allocation6], 1 }
 0x5f6   :  { %691 = vsyncpa [#allocation9], 1 }
 0x5f7   :  { %692 = vsyncpa [#allocation4], 1 }

</bundles_post_ra>
